<compile_context>
chip_gen: v7x
topology: tpu7x:2x2x1
jax: 0.10.0
libtpu: 0.0.40
codegen_flags: <defaults>
</compile_context>

<pallas_src>
import jax
import jax.numpy as jnp
from jax.experimental import pallas as pl
from jax.experimental.pallas import tpu as pltpu  # noqa: F401  (kept for future tiling / CompilerParams)


# ------------------------------ fused kernel ----------------------------------

def _fused_gnn_kernel(x_ref, a_src_row_ref, s_dst_wide_ref, neg_wide_ref, neg_ref,
                      w1_ref, b1_ref, bd_ones_ref,
                      w2_ref, a2_ref, b2_ref,
                      pool_ref, wfc_ref, bfc_ref, o_ref):
    hc = b1_ref.shape[1]                # heads * c (128)
    c = b2_ref.shape[1]                 # hidden channels per head (32)
    heads = hc // c                     # conv1 heads (4)

    x = x_ref[...]                      # (N, 1)

    # --------------------- conv1: GATConv(1 -> heads*c), concat -------------------
    # Fin == 1: feature transform and attention projections are pure VPU broadcasts.
    h1 = x * w1_ref[...]                                            # (N, heads*c)

    # Lane-dense attention logits: e1[i, h*N+j] = LeakyReLU(a_dst[h,i] + a_src[h,j]) + mask
    e1 = x * s_dst_wide_ref[...] + a_src_row_ref[...]               # (N, heads*N)
    e1 = jnp.where(e1 > 0.0, e1, 0.2 * e1)                          # LeakyReLU(0.2)
    e1 = e1 + neg_wide_ref[...]                                     # additive -1e30 mask

    # Softmax over incoming edges, all heads at once.  Row max over all 128 lanes is a
    # per-head-constant shift (softmax-invariant); fine numerically at these scales.
    m1 = jnp.max(e1, axis=1, keepdims=True)                         # (N, 1)
    p1 = jnp.exp(e1 - m1)                                           # masked entries -> 0

    # Per-head aggregation + per-head denominators as two (N,128)@(128,128) matmuls.
    bd = bd_ones_ref[...]                                           # (heads*N, heads*c) 0/1
    h1_bd = jnp.concatenate([h1] * heads, axis=0) * bd              # block-diagonal h1
    num1 = jnp.dot(p1, h1_bd, preferred_element_type=jnp.float32)   # (N, heads*c)
    den1 = jnp.maximum(jnp.dot(p1, bd, preferred_element_type=jnp.float32), 1e-20)
    h1o = num1 * pl.reciprocal(den1, approx=True) + b1_ref[...]     # (N, heads*c)
    h1o = jnp.where(h1o > 0.0, h1o, jnp.exp(h1o) - 1.0)             # ELU
    # dropout(p=0.2) is the identity in eval mode.

    # --------------------- conv2: GATConv(heads*c -> c), 1 head -------------------
    h2lin = jnp.dot(h1o, w2_ref[...], preferred_element_type=jnp.float32)   # (N, c)
    as2 = jnp.dot(h2lin, a2_ref[...], preferred_element_type=jnp.float32)   # (N, 2)
    at2 = jnp.transpose(as2)                                                # (2, N)
    e2 = as2[:, 1:2] + at2[0:1, :]                                  # a_dst col + a_src row
    e2 = jnp.where(e2 > 0.0, e2, 0.2 * e2)
    e2 = e2 + neg_ref[...]
    m2 = jnp.max(e2, axis=1, keepdims=True)
    p2 = jnp.exp(e2 - m2)
    d2 = jnp.maximum(jnp.sum(p2, axis=1, keepdims=True), 1e-20)
    h2 = (jnp.dot(p2, h2lin, preferred_element_type=jnp.float32)
          * pl.reciprocal(d2, approx=True) + b2_ref[...])
    h2 = jnp.where(h2 > 0.0, h2, jnp.exp(h2) - 1.0)                 # ELU

    # --------------- global_mean_pool + fc + log_softmax --------------------------
    pooled = jnp.dot(pool_ref[...], h2, preferred_element_type=jnp.float32)   # (B, c)
    logits = jnp.dot(pooled, wfc_ref[...],
                     preferred_element_type=jnp.float32) + bfc_ref[...]        # (B, 2)
    mm = jnp.max(logits, axis=1, keepdims=True)
    z = logits - mm
    lse = jnp.log(jnp.sum(jnp.exp(z), axis=1, keepdims=True))
    o_ref[...] = z - lse


# ------------------------------ setup (hoisted) --------------------------------

def prepare_gnn4x4(params, adj, batch, num_graphs):
    """Build every parameter/graph-structure derived constant ONCE, outside the
    per-call path (the previous version rebuilt them per call)."""
    n = adj.shape[0]
    heads, c = params["att1_src"].shape

    # Fin == 1: h1 @ [att_src|att_dst] == x * (w1 @ [att_src|att_dst]) -> per-head scalars.
    w1h = params["w1"].reshape(heads, c)
    s_src = jnp.sum(w1h * params["att1_src"], axis=1)               # (heads,)
    s_dst = jnp.sum(w1h * params["att1_dst"], axis=1)               # (heads,)
    s_src_wide = jnp.repeat(s_src, n)[None, :].astype(jnp.float32)  # (1, heads*N)
    s_dst_wide = jnp.repeat(s_dst, n)[None, :].astype(jnp.float32)  # (1, heads*N)

    # conv2 attention projection matrix: columns = [att_src, att_dst].
    a2 = jnp.concatenate([params["att2_src"].T, params["att2_dst"].T], axis=1)  # (c, 2)

    # Block-diagonal ones (heads*N, heads*c): segment-sum / block-diag-h1 mask.
    row_head = jnp.arange(heads * n) // n
    col_head = jnp.arange(heads * c) // c
    bd_ones = (row_head[:, None] == col_head[None, :]).astype(jnp.float32)

    # Graph-structure constants (adj is static): additive mask and pooling matrix.
    neg = jnp.where(adj > 0.0, 0.0, -1e30).astype(jnp.float32)      # (N, N)
    neg_wide = jnp.tile(neg, (1, heads))                            # (N, heads*N)
    onehot = (batch[None, :] == jnp.arange(num_graphs)[:, None]).astype(jnp.float32)
    counts = jnp.maximum(jnp.sum(onehot, axis=1, keepdims=True), 1.0)
    pool_mat = onehot / counts                                      # (B, N)

    return {
        "s_src_wide": s_src_wide, "s_dst_wide": s_dst_wide,
        "neg": neg, "neg_wide": neg_wide, "pool_mat": pool_mat,
        "w1": params["w1"], "b1": params["b1"],
        "w2": params["w2"], "a2": a2, "b2": params["b2"],
        "bd_ones": bd_ones,
        "wfc": params["wfc"], "bfc": params["bfc"],
    }


# ------------------------------- per-call forward ------------------------------

@jax.jit
def gnn4x4_forward(x, prep):
    n = x.shape[0]
    heads = prep["s_dst_wide"].shape[1] // n
    b = prep["pool_mat"].shape[0]
    n_out = prep["wfc"].shape[1]

    # Only x-dependent prep left per call: the lane-dense source row
    # a_src_row[0, h*N+j] = x[j] * s_src[h]   (2-3 tiny HLOs).
    a_src_row = jnp.tile(x.reshape(1, n), (1, heads)) * prep["s_src_wide"]

    return pl.pallas_call(
        _fused_gnn_kernel,
        out_shape=jax.ShapeDtypeStruct((b, n_out), jnp.float32),
    )(x, a_src_row, prep["s_dst_wide"], prep["neg_wide"], prep["neg"],
      prep["w1"], prep["b1"], prep["bd_ones"],
      prep["w2"], prep["a2"], prep["b2"],
      prep["pool_mat"], prep["wfc"], prep["bfc"])


# --------------------------- pure-JAX reference --------------------------------

def _gat_ref(x, w, att_src, att_dst, bias, adj, heads, c):
    h = x @ w
    outs = []
    for hd in range(heads):
        hh = h[:, hd * c:(hd + 1) * c]
        a_s = hh @ att_src[hd]
        a_d = hh @ att_dst[hd]
        e = a_d[:, None] + a_s[None, :]
        e = jnp.where(e > 0.0, e, 0.2 * e)
        e = jnp.where(adj > 0.0, e, -jnp.inf)
        alpha = jax.nn.softmax(e, axis=1)
        outs.append(alpha @ hh)
    return jnp.concatenate(outs, axis=1) + bias


def _forward_ref(x, adj, batch, params, num_graphs):
    h1 = jax.nn.elu(_gat_ref(x, params["w1"], params["att1_src"], params["att1_dst"],
                             params["b1"], adj, 4, 32))
    h2 = jax.nn.elu(_gat_ref(h1, params["w2"], params["att2_src"], params["att2_dst"],
                             params["b2"], adj, 1, 32))
    seg_sum = jax.ops.segment_sum(h2, batch, num_segments=num_graphs)
    cnt = jax.ops.segment_sum(jnp.ones((h2.shape[0], 1), jnp.float32), batch,
                              num_segments=num_graphs)
    pooled = seg_sum / jnp.maximum(cnt, 1.0)
    logits = pooled @ params["wfc"] + params["bfc"]
    return jax.nn.log_softmax(logits, axis=1)


# --------------------------------- test setup ---------------------------------

def _grid_edges_4x4(node_offset):
    """Directed edge list (both directions) of a 4x4 grid graph."""
    edges = []
    for r in range(4):
        for c in range(4):
            u = node_offset + r * 4 + c
            if c + 1 < 4:
                v = node_offset + r * 4 + (c + 1)
                edges += [(u, v), (v, u)]
            if r + 1 < 4:
                v = node_offset + (r + 1) * 4 + c
                edges += [(u, v), (v, u)]
    return edges


if __name__ == "__main__":
    key = jax.random.PRNGKey(0)
    ks = jax.random.split(key, 12)

    input_dim, hidden = 1, 32
    num_graphs = 2
    n_per_graph = 16                       # 4x4 grid
    N = num_graphs * n_per_graph           # 32 nodes total

    # node features x: (N, input_dim)
    x = jax.random.normal(ks[0], (N, input_dim), dtype=jnp.float32)

    # edge_index for two disjoint 4x4 grid graphs
    edges = _grid_edges_4x4(0) + _grid_edges_4x4(n_per_graph)
    src = jnp.array([e[0] for e in edges], dtype=jnp.int32)
    dst = jnp.array([e[1] for e in edges], dtype=jnp.int32)

    # dense adjacency mask adj[dst, src] with self-loops (PyG add_self_loops=True)
    adj = jnp.zeros((N, N), dtype=jnp.float32).at[dst, src].set(1.0)
    adj = adj.at[jnp.arange(N), jnp.arange(N)].set(1.0)

    # batch assignment: graph 0 / graph 1
    batch = jnp.concatenate([jnp.zeros(n_per_graph, jnp.int32),
                             jnp.ones(n_per_graph, jnp.int32)])

    # deterministic synthetic parameters (shapes follow GATConv / Linear in __init__)
    params = {
        "w1":       0.1 * jax.random.normal(ks[1], (input_dim, 4 * hidden), jnp.float32),
        "att1_src": 0.1 * jax.random.normal(ks[2], (4, hidden), jnp.float32),
        "att1_dst": 0.1 * jax.random.normal(ks[3], (4, hidden), jnp.float32),
        "b1":       0.1 * jax.random.normal(ks[4], (1, 4 * hidden), jnp.float32),
        "w2":       0.1 * jax.random.normal(ks[5], (4 * hidden, hidden), jnp.float32),
        "att2_src": 0.1 * jax.random.normal(ks[6], (1, hidden), jnp.float32),
        "att2_dst": 0.1 * jax.random.normal(ks[7], (1, hidden), jnp.float32),
        "b2":       0.1 * jax.random.normal(ks[8], (1, hidden), jnp.float32),
        "wfc":      0.1 * jax.random.normal(ks[9], (hidden, 2), jnp.float32),
        "bfc":      0.1 * jax.random.normal(ks[10], (1, 2), jnp.float32),
    }

    # one-time setup (hoisted constants), then the per-call kernel
    prep = prepare_gnn4x4(params, adj, batch, num_graphs)
    prep = jax.tree_util.tree_map(jax.block_until_ready, prep)

    out = gnn4x4_forward(x, prep)
    out = jax.block_until_ready(out)

    assert out.shape == (num_graphs, 2)
    assert bool(jnp.all(jnp.isfinite(out)))
    # rows of log_softmax must exp-sum to 1
    assert bool(jnp.allclose(jnp.sum(jnp.exp(out), axis=1), 1.0, atol=1e-5))

    # correctness against a pure-JAX reference of the same dense-GAT math
    with jax.default_matmul_precision("highest"):
        ref = _forward_ref(x, adj, batch, params, num_graphs)
    assert bool(jnp.allclose(out, ref, atol=2e-3, rtol=2e-3)), (out, ref)

    print("KERNEL_OK")
</pallas_src>

<mosaic_0001>
module attributes {stable_mosaic.version = 11 : i64} {
  func.func @_fused_gnn_kernel(%arg0: memref<32x1xf32, #tpu.memory_space<vmem>>, %arg1: memref<1x128xf32, #tpu.memory_space<vmem>>, %arg2: memref<1x128xf32, #tpu.memory_space<vmem>>, %arg3: memref<32x128xf32, #tpu.memory_space<vmem>>, %arg4: memref<32x32xf32, #tpu.memory_space<vmem>>, %arg5: memref<1x128xf32, #tpu.memory_space<vmem>>, %arg6: memref<1x128xf32, #tpu.memory_space<vmem>>, %arg7: memref<128x128xf32, #tpu.memory_space<vmem>>, %arg8: memref<128x32xf32, #tpu.memory_space<vmem>>, %arg9: memref<32x2xf32, #tpu.memory_space<vmem>>, %arg10: memref<1x32xf32, #tpu.memory_space<vmem>>, %arg11: memref<2x32xf32, #tpu.memory_space<vmem>>, %arg12: memref<32x2xf32, #tpu.memory_space<vmem>>, %arg13: memref<1x2xf32, #tpu.memory_space<vmem>>, %arg14: memref<2x2xf32, #tpu.memory_space<vmem>>) attributes {dimension_semantics = [], scalar_prefetch = 0 : i64, scratch_operands = 0 : i64, tpu.core_type = #tpu.core_type<tc>} {
    %c0 = arith.constant 0 : index
    %c0_0 = arith.constant 0 : index
    %0 = vector.load %arg0[%c0, %c0_0] : memref<32x1xf32, #tpu.memory_space<vmem>>, vector<32x1xf32>
    %c0_1 = arith.constant 0 : index
    %c0_2 = arith.constant 0 : index
    %1 = vector.load %arg5[%c0_1, %c0_2] : memref<1x128xf32, #tpu.memory_space<vmem>>, vector<1x128xf32>
    %2 = vector.broadcast %0 : vector<32x1xf32> to vector<32x128xf32>
    %3 = vector.broadcast %1 : vector<1x128xf32> to vector<32x128xf32>
    %4 = arith.mulf %2, %3 : vector<32x128xf32>
    %c0_3 = arith.constant 0 : index
    %c0_4 = arith.constant 0 : index
    %5 = vector.load %arg2[%c0_3, %c0_4] : memref<1x128xf32, #tpu.memory_space<vmem>>, vector<1x128xf32>
    %6 = vector.broadcast %0 : vector<32x1xf32> to vector<32x128xf32>
    %7 = vector.broadcast %5 : vector<1x128xf32> to vector<32x128xf32>
    %8 = arith.mulf %6, %7 : vector<32x128xf32>
    %c0_5 = arith.constant 0 : index
    %c0_6 = arith.constant 0 : index
    %9 = vector.load %arg1[%c0_5, %c0_6] : memref<1x128xf32, #tpu.memory_space<vmem>>, vector<1x128xf32>
    %10 = vector.broadcast %9 : vector<1x128xf32> to vector<32x128xf32>
    %11 = arith.addf %8, %10 : vector<32x128xf32>
    %cst = arith.constant 0.000000e+00 : f32
    %12 = vector.broadcast %cst : f32 to vector<32x128xf32>
    %13 = arith.cmpf ogt, %11, %12 : vector<32x128xf32>
    %cst_7 = arith.constant 2.000000e-01 : f32
    %14 = vector.broadcast %cst_7 : f32 to vector<32x128xf32>
    %15 = arith.mulf %14, %11 : vector<32x128xf32>
    %16 = arith.select %13, %11, %15 : vector<32x128xi1>, vector<32x128xf32>
    %c0_8 = arith.constant 0 : index
    %c0_9 = arith.constant 0 : index
    %17 = vector.load %arg3[%c0_8, %c0_9] : memref<32x128xf32, #tpu.memory_space<vmem>>, vector<32x128xf32>
    %18 = arith.addf %16, %17 : vector<32x128xf32>
    %cst_10 = arith.constant dense<0xFF800000> : vector<32xf32>
    %19 = vector.multi_reduction <maximumf>, %18, %cst_10 [1] : vector<32x128xf32> to vector<32xf32>
    %20 = vector.shape_cast %19 : vector<32xf32> to vector<32x1xf32>
    %21 = vector.broadcast %20 : vector<32x1xf32> to vector<32x128xf32>
    %22 = arith.subf %18, %21 : vector<32x128xf32>
    %23 = math.exp %22 : vector<32x128xf32>
    %c0_11 = arith.constant 0 : index
    %c0_12 = arith.constant 0 : index
    %24 = vector.load %arg7[%c0_11, %c0_12] : memref<128x128xf32, #tpu.memory_space<vmem>>, vector<128x128xf32>
    %25 = tpu.concatenate %4, %4, %4, %4 in 0 : vector<32x128xf32>, vector<32x128xf32>, vector<32x128xf32>, vector<32x128xf32> -> vector<128x128xf32>
    %26 = arith.mulf %25, %24 : vector<128x128xf32>
    %cst_13 = arith.constant dense<0.000000e+00> : vector<32x128xf32>
    %27 = tpu.matmul %23, %26, %cst_13 {dimension_numbers = #tpu.dot_dimension_numbers<[1], [0], [0], [1], [0, 0, 1, 1], [], []>} : vector<32x128xf32>, vector<128x128xf32>, vector<32x128xf32> -> vector<32x128xf32>
    %cst_14 = arith.constant dense<0.000000e+00> : vector<32x128xf32>
    %28 = tpu.matmul %23, %24, %cst_14 {dimension_numbers = #tpu.dot_dimension_numbers<[1], [0], [0], [1], [0, 0, 1, 1], [], []>} : vector<32x128xf32>, vector<128x128xf32>, vector<32x128xf32> -> vector<32x128xf32>
    %cst_15 = arith.constant 9.99999968E-21 : f32
    %29 = vector.broadcast %cst_15 : f32 to vector<32x128xf32>
    %30 = arith.maximumf %28, %29 : vector<32x128xf32>
    %31 = tpu.reciprocal %30 {approx = true} : vector<32x128xf32> -> vector<32x128xf32>
    %32 = arith.mulf %27, %31 : vector<32x128xf32>
    %c0_16 = arith.constant 0 : index
    %c0_17 = arith.constant 0 : index
    %33 = vector.load %arg6[%c0_16, %c0_17] : memref<1x128xf32, #tpu.memory_space<vmem>>, vector<1x128xf32>
    %34 = vector.broadcast %33 : vector<1x128xf32> to vector<32x128xf32>
    %35 = arith.addf %32, %34 : vector<32x128xf32>
    %cst_18 = arith.constant 0.000000e+00 : f32
    %36 = vector.broadcast %cst_18 : f32 to vector<32x128xf32>
    %37 = arith.cmpf ogt, %35, %36 : vector<32x128xf32>
    %38 = math.exp %35 : vector<32x128xf32>
    %cst_19 = arith.constant 1.000000e+00 : f32
    %39 = vector.broadcast %cst_19 : f32 to vector<32x128xf32>
    %40 = arith.subf %38, %39 : vector<32x128xf32>
    %41 = arith.select %37, %35, %40 : vector<32x128xi1>, vector<32x128xf32>
    %c0_20 = arith.constant 0 : index
    %c0_21 = arith.constant 0 : index
    %42 = vector.load %arg8[%c0_20, %c0_21] : memref<128x32xf32, #tpu.memory_space<vmem>>, vector<128x32xf32>
    %cst_22 = arith.constant dense<0.000000e+00> : vector<32x32xf32>
    %43 = tpu.matmul %41, %42, %cst_22 {dimension_numbers = #tpu.dot_dimension_numbers<[1], [0], [0], [1], [0, 0, 1, 1], [], []>} : vector<32x128xf32>, vector<128x32xf32>, vector<32x32xf32> -> vector<32x32xf32>
    %c0_23 = arith.constant 0 : index
    %c0_24 = arith.constant 0 : index
    %44 = vector.load %arg9[%c0_23, %c0_24] : memref<32x2xf32, #tpu.memory_space<vmem>>, vector<32x2xf32>
    %cst_25 = arith.constant dense<0.000000e+00> : vector<32x2xf32>
    %45 = tpu.matmul %43, %44, %cst_25 {dimension_numbers = #tpu.dot_dimension_numbers<[1], [0], [0], [1], [0, 0, 1, 1], [], []>} : vector<32x32xf32>, vector<32x2xf32>, vector<32x2xf32> -> vector<32x2xf32>
    %46 = tpu.transpose %45, [1, 0] : vector<32x2xf32> -> vector<2x32xf32>
    %47 = vector.extract_strided_slice %45 {offsets = [0, 1], sizes = [32, 1], strides = [1, 1]} : vector<32x2xf32> to vector<32x1xf32>
    %48 = vector.extract_strided_slice %46 {offsets = [0, 0], sizes = [1, 32], strides = [1, 1]} : vector<2x32xf32> to vector<1x32xf32>
    %49 = vector.broadcast %47 : vector<32x1xf32> to vector<32x32xf32>
    %50 = vector.broadcast %48 : vector<1x32xf32> to vector<32x32xf32>
    %51 = arith.addf %49, %50 : vector<32x32xf32>
    %cst_26 = arith.constant 0.000000e+00 : f32
    %52 = vector.broadcast %cst_26 : f32 to vector<32x32xf32>
    %53 = arith.cmpf ogt, %51, %52 : vector<32x32xf32>
    %cst_27 = arith.constant 2.000000e-01 : f32
    %54 = vector.broadcast %cst_27 : f32 to vector<32x32xf32>
    %55 = arith.mulf %54, %51 : vector<32x32xf32>
    %56 = arith.select %53, %51, %55 : vector<32x32xi1>, vector<32x32xf32>
    %c0_28 = arith.constant 0 : index
    %c0_29 = arith.constant 0 : index
    %57 = vector.load %arg4[%c0_28, %c0_29] : memref<32x32xf32, #tpu.memory_space<vmem>>, vector<32x32xf32>
    %58 = arith.addf %56, %57 : vector<32x32xf32>
    %cst_30 = arith.constant dense<0xFF800000> : vector<32xf32>
    %59 = vector.multi_reduction <maximumf>, %58, %cst_30 [1] : vector<32x32xf32> to vector<32xf32>
    %60 = vector.shape_cast %59 : vector<32xf32> to vector<32x1xf32>
    %61 = vector.broadcast %60 : vector<32x1xf32> to vector<32x32xf32>
    %62 = arith.subf %58, %61 : vector<32x32xf32>
    %63 = math.exp %62 : vector<32x32xf32>
    %cst_31 = arith.constant dense<0.000000e+00> : vector<32xf32>
    %64 = vector.multi_reduction <add>, %63, %cst_31 [1] : vector<32x32xf32> to vector<32xf32>
    %65 = vector.shape_cast %64 : vector<32xf32> to vector<32x1xf32>
    %cst_32 = arith.constant 9.99999968E-21 : f32
    %66 = vector.broadcast %cst_32 : f32 to vector<32x1xf32>
    %67 = arith.maximumf %65, %66 : vector<32x1xf32>
    %cst_33 = arith.constant dense<0.000000e+00> : vector<32x32xf32>
    %68 = tpu.matmul %63, %43, %cst_33 {dimension_numbers = #tpu.dot_dimension_numbers<[1], [0], [0], [1], [0, 0, 1, 1], [], []>} : vector<32x32xf32>, vector<32x32xf32>, vector<32x32xf32> -> vector<32x32xf32>
    %69 = tpu.reciprocal %67 {approx = true} : vector<32x1xf32> -> vector<32x1xf32>
    %70 = vector.broadcast %69 : vector<32x1xf32> to vector<32x32xf32>
    %71 = arith.mulf %68, %70 : vector<32x32xf32>
    %c0_34 = arith.constant 0 : index
    %c0_35 = arith.constant 0 : index
    %72 = vector.load %arg10[%c0_34, %c0_35] : memref<1x32xf32, #tpu.memory_space<vmem>>, vector<1x32xf32>
    %73 = vector.broadcast %72 : vector<1x32xf32> to vector<32x32xf32>
    %74 = arith.addf %71, %73 : vector<32x32xf32>
    %cst_36 = arith.constant 0.000000e+00 : f32
    %75 = vector.broadcast %cst_36 : f32 to vector<32x32xf32>
    %76 = arith.cmpf ogt, %74, %75 : vector<32x32xf32>
    %77 = math.exp %74 : vector<32x32xf32>
    %cst_37 = arith.constant 1.000000e+00 : f32
    %78 = vector.broadcast %cst_37 : f32 to vector<32x32xf32>
    %79 = arith.subf %77, %78 : vector<32x32xf32>
    %80 = arith.select %76, %74, %79 : vector<32x32xi1>, vector<32x32xf32>
    %c0_38 = arith.constant 0 : index
    %c0_39 = arith.constant 0 : index
    %81 = vector.load %arg11[%c0_38, %c0_39] : memref<2x32xf32, #tpu.memory_space<vmem>>, vector<2x32xf32>
    %cst_40 = arith.constant dense<0.000000e+00> : vector<2x32xf32>
    %82 = tpu.matmul %81, %80, %cst_40 {dimension_numbers = #tpu.dot_dimension_numbers<[1], [0], [0], [1], [0, 0, 1, 1], [], []>} : vector<2x32xf32>, vector<32x32xf32>, vector<2x32xf32> -> vector<2x32xf32>
    %c0_41 = arith.constant 0 : index
    %c0_42 = arith.constant 0 : index
    %83 = vector.load %arg12[%c0_41, %c0_42] : memref<32x2xf32, #tpu.memory_space<vmem>>, vector<32x2xf32>
    %cst_43 = arith.constant dense<0.000000e+00> : vector<2x2xf32>
    %84 = tpu.matmul %82, %83, %cst_43 {dimension_numbers = #tpu.dot_dimension_numbers<[1], [0], [0], [1], [0, 0, 1, 1], [], []>} : vector<2x32xf32>, vector<32x2xf32>, vector<2x2xf32> -> vector<2x2xf32>
    %c0_44 = arith.constant 0 : index
    %c0_45 = arith.constant 0 : index
    %85 = vector.load %arg13[%c0_44, %c0_45] : memref<1x2xf32, #tpu.memory_space<vmem>>, vector<1x2xf32>
    %86 = vector.broadcast %85 : vector<1x2xf32> to vector<2x2xf32>
    %87 = arith.addf %84, %86 : vector<2x2xf32>
    %cst_46 = arith.constant dense<0xFF800000> : vector<2xf32>
    %88 = vector.multi_reduction <maximumf>, %87, %cst_46 [1] : vector<2x2xf32> to vector<2xf32>
    %89 = vector.shape_cast %88 : vector<2xf32> to vector<2x1xf32>
    %90 = vector.broadcast %89 : vector<2x1xf32> to vector<2x2xf32>
    %91 = arith.subf %87, %90 : vector<2x2xf32>
    %92 = math.exp %91 : vector<2x2xf32>
    %cst_47 = arith.constant dense<0.000000e+00> : vector<2xf32>
    %93 = vector.multi_reduction <add>, %92, %cst_47 [1] : vector<2x2xf32> to vector<2xf32>
    %94 = vector.shape_cast %93 : vector<2xf32> to vector<2x1xf32>
    %95 = math.log %94 : vector<2x1xf32>
    %96 = vector.broadcast %95 : vector<2x1xf32> to vector<2x2xf32>
    %97 = arith.subf %91, %96 : vector<2x2xf32>
    %c0_48 = arith.constant 0 : index
    %c0_49 = arith.constant 0 : index
    %98 = vector.load %arg14[%c0_48, %c0_49] : memref<2x2xf32, #tpu.memory_space<vmem>>, vector<2x2xf32>
    tpu.vector_store %arg14[%c0_48, %c0_49], %97 {strides = array<i32>} : memref<2x2xf32, #tpu.memory_space<vmem>>, vector<2x2xf32>,
    return
  }
}

</mosaic_0001>

<bundles_post_ra>
// kernel: mul.1
= control target key start
LH: loop header
LB: loop body
LE: loop exit
PB: predicated region body
PF: predicated region fallthrough
CT: control target
= control target key end

     0   :  { %s34_s0 = inlined_call_operand.vmem [shape: f32[1,128], index: 0, kind: input, shape index: {}]   ;;  %s35_s1 = inlined_call_operand.vmem [shape: f32[1,128], index: 1, kind: input, shape index: {}]   ;;  %s36_s2 = inlined_call_operand.vmem [shape: f32[1,128], index: 2, kind: output, shape index: {}]  }
   0x1   :  { %v3_v0 = vld [vmem:[%s34_s0] sm:$0x1] }
   0x2   :  { %v4_v1 = vld [vmem:[%s35_s1] sm:$0x1] }
   0x3   :  { %v7_v2 = vmul.f32 %v4_v1, %v3_v0 }
   0x5   :  { %9 = vst [vmem:[%s36_s2] sm:$0x1] %v7_v2 }

// kernel: gnn4x4_forward.1
= control target key start
LH: loop header
LB: loop body
LE: loop exit
PB: predicated region body
PF: predicated region fallthrough
CT: control target
= control target key end

     0   :  { %v1519_v2 = vmov 0   ;;  %s1848_s0 = inlined_call_operand.vmem [shape: f32[32,1], index: 0, kind: input, shape index: {}]   ;;  %s1849_s1 = inlined_call_operand.vmem [shape: f32[1,128], index: 1, kind: input, shape index: {}]   ;;  %s1850_s2 = inlined_call_operand.vmem [shape: f32[1,128], index: 2, kind: input, shape index: {}]   ;;  %s1851_s3 = inlined_call_operand.vmem [shape: f32[32,128], index: 3, kind: input, shape index: {}]   ;;  %s1852_s4 = inlined_call_operand.vmem [shape: f32[32,32], index: 4, kind: input, shape index: {}]   ;;  %s1853_s5 = inlined_call_operand.vmem [shape: f32[1,128], index: 5, kind: input, shape index: {}]   ;;  %s1854_s6 = inlined_call_operand.vmem [shape: f32[1,128], index: 6, kind: input, shape index: {}]   ;;  %s1855_s7 = inlined_call_operand.vmem [shape: f32[128,128], index: 7, kind: input, shape index: {}]   ;;  %s1856_s8 = inlined_call_operand.vmem [shape: f32[128,32], index: 8, kind: input, shape index: {}]   ;;  %s1857_s9 = inlined_call_operand.vmem [shape: f32[32,2], index: 9, kind: input, shape index: {}]   ;;  %s1858_s10 = inlined_call_operand.vmem [shape: f32[1,32], index: 10, kind: input, shape index: {}]   ;;  %s1859_s11 = inlined_call_operand.vmem [shape: f32[2,32], index: 11, kind: input, shape index: {}]   ;;  %s1860_s12 = inlined_call_operand.vmem [shape: f32[32,2], index: 12, kind: input, shape index: {}]   ;;  %s1861_s13 = inlined_call_operand.vmem [shape: f32[1,2], index: 13, kind: input, shape index: {}]   ;;  %s1862_s14 = inlined_call_operand.hbm [shape: f32[2,2], index: 14, kind: output, shape index: {}]  }
   0x1   :  { %v50_v0 = vld [vmem:[%s1848_s0 + $0x10] sm:$0xff]  ;;  %v48_v1 = vld [vmem:[%s1848_s0] sm:$0xff]  ;;  %1440 = vset.pattern.permute.xlu1 %v1519_v2  ;;  %1439 = vset.pattern.permute.xlu0 %v1519_v2 }
   0x2   :  { %65 = vperm.xlu1 %1440, %v50_v0   ;;  %55 = vperm.xlu0 %1439, %v48_v1  }
   0x3   :  { %19 = vsyncpa [#allocation3], 0  ;;  %v51_v3 = vld [vmem:[%s1848_s0 + $0x18] sm:$0xff]  ;;  %v49_v4 = vld [vmem:[%s1848_s0 + $0x8] sm:$0xff]  ;;  %vm495_vm8 = vcmask 261120   ;;  %vm1522_vm13 = vmmov 0  }
   0x4   :  { %v145_v5 = vld [vmem:[%s1855_s7] sm:$0xff]  ;;  %v146_v6 = vld [vmem:[%s1855_s7 + $0x8] sm:$0xff]  ;;  %v147_v7 = vld [vmem:[%s1855_s7 + $0x10] sm:$0xff] }
   0x5   :  { %v148_v8 = vld [vmem:[%s1855_s7 + $0x18] sm:$0xff]  ;;  %v1341_v9 = vpack.c.bf16 %v146_v6, %v145_v5  ;;  %v149_v11 = vld [vmem:[%s1855_s7 + $0x20] sm:$0xff]  ;;  %v150_v12 = vld [vmem:[%s1855_s7 + $0x28] sm:$0xff] }
   0x6   :  { %70 = vperm.xlu1 %1440, %v51_v3   ;;  %60 = vperm.xlu0 %1439, %v49_v4   ;;  %v1345_v10 = vpack.c.bf16 %v148_v8, %v147_v7  ;;  %v1349_v13 = vpack.c.bf16 %v150_v12, %v149_v11  ;;  %v151_v14 = vld [vmem:[%s1855_s7 + $0x30] sm:$0xff]  ;;  %v152_v15 = vld [vmem:[%s1855_s7 + $0x38] sm:$0xff]  ;;  %v1035_v17 = vld [vmem:[%s1853_s5] ss:$0 sm:$0xff] }
   0x7   :  { %1342 = vmatprep.subr.bf16.mxu1 %v1341_v9  ;;  %v1353_v16 = vpack.c.bf16 %v152_v15, %v151_v14  ;;  %v1036_v18 = vld [vmem:[%s1850_s2] ss:$0 sm:$0xff]  ;;  %v119_v45 = vld [vmem:[%s1851_s3 + $0x10] sm:$0xff]  ;;  %v118_v50 = vld [vmem:[%s1851_s3 + $0x8] sm:$0xff] }
   0x8   :  { %1344 = vmatpush3.bf16.msra.mxu1 %v1341_v9  ;;  %v1037_v19 = vld [vmem:[%s1849_s1] ss:$0 sm:$0xff]  ;;  %v120_v58 = vld [vmem:[%s1851_s3 + $0x18] sm:$0xff]  ;;  %v154_v62 = vld [vmem:[%s1855_s7 + $0x48] sm:$0xff] }
   0x9   :  { %1346 = vmatprep.subr.bf16.mxu1 %v1345_v10  ;;  %v117_v36 = vld [vmem:[%s1851_s3] sm:$0xff]  ;;  %v155_v3 = vld [vmem:[%s1855_s7 + $0x50] sm:$0xff]  ;;  %v156_v4 = vld [vmem:[%s1855_s7 + $0x58] sm:$0xff] }
   0xa   :  { %v153_v0 = vld [vmem:[%s1855_s7 + $0x40] sm:$0xff]  ;;  %v158_v9 = vld [vmem:[%s1855_s7 + $0x68] sm:$0xff] }
   0xc   :  { %1348 = vmatpush3.bf16.msra.mxu1 %v1345_v10  ;;  %v157_v10 = vld [vmem:[%s1855_s7 + $0x60] sm:$0xff] }
   0xd   :  { %1350 = vmatprep.subr.bf16.mxu1 %v1349_v13 }
  0x10   :  { %1352 = vmatpush3.bf16.msra.mxu1 %v1349_v13  ;;  %v159_v13 = vld [vmem:[%s1855_s7 + $0x70] sm:$0xff] }
  0x11   :  { %1354 = vmatprep.subr.bf16.mxu1 %v1353_v16 }
  0x14   :  { %1356 = vmatpush3.bf16.msra.mxu1 %v1353_v16  ;;  %v1357_v16 = vpack.c.bf16 %v154_v62, %v153_v0 }
  0x16   :  { %1358 = vmatprep.subr.bf16.mxu1 %v1357_v16 }
  0x18   :  { %1360 = vmatpush3.bf16.msra.mxu1 %v1357_v16 }
  0x81   :  { %v66_v20 = vpop.permute.xlu1 %65  ;;  %v56_v21 = vpop.permute.xlu0 %55 }
  0x82   :  { %v1645_v22 = vmul.f32 %v1035_v17, %v66_v20  ;;  %v92_v23 = vmul.f32 %v1036_v18, %v66_v20  ;;  %v1647_v24 = vmul.f32 %v1035_v17, %v56_v21  ;;  %v90_v25 = vmul.f32 %v1036_v18, %v56_v21 }
  0x83   :  { %v1361_v20 = vpack.c.bf16 %v156_v4, %v155_v3 }
  0x84   :  { %v103_v26 = vadd.f32 %v1037_v19, %v92_v23  ;;  %v101_v27 = vadd.f32 %v1037_v19, %v90_v25  ;;  %v161_v30 = vmul.f32 %v145_v5, %v1647_v24  ;;  %v163_v31 = vmul.f32 %v147_v7, %v1645_v22 }
  0x85   :  { %v71_v28 = vpop.permute.xlu1 %70  ;;  %v61_v29 = vpop.permute.xlu0 %60  ;;  %v165_v56 = vmul.f32 %v149_v11, %v1647_v24  ;;  %v167_v60 = vmul.f32 %v151_v14, %v1645_v22  ;;  %v169_v5 = vmul.f32 %v153_v0, %v1647_v24  ;;  %v171_v7 = vmul.f32 %v155_v3, %v1645_v22  ;;  %v160_v14 = vld [vmem:[%s1855_s7 + $0x78] sm:$0xff]  ;;  %1362 = vmatprep.subr.bf16.mxu1 %v1361_v20  ;;  %v491_v0 = vld [vmem:[%s1857_s9] sm:$0xff] }
  0x86   :  { %v1651_v32 = vmul.f32 %v1035_v17, %v71_v28  ;;  %v93_v33 = vmul.f32 %v1036_v18, %v71_v28  ;;  %v80_v34 = vmul.f32 %v1035_v17, %v61_v29  ;;  %v91_v35 = vmul.f32 %v1036_v18, %v61_v29  ;;  %1364 = vmatpush3.bf16.msra.mxu1 %v1361_v20 }
  0x87   :  { %vm105_vm0 = vcmp.gt.f32.partialorder %v101_v27, 0.0  ;;  %v109_v37 = vmul.f32 0.2, %v101_v27  ;;  %vm107_vm1 = vcmp.gt.f32.partialorder %v103_v26, 0.0  ;;  %v111_v38 = vmul.f32 0.2, %v103_v26 }
  0x88   :  { %v104_v39 = vadd.f32 %v1037_v19, %v93_v33  ;;  %v102_v40 = vadd.f32 %v1037_v19, %v91_v35  ;;  %v162_v41 = vmul.f32 %v146_v6, %v80_v34  ;;  %v164_v42 = vmul.f32 %v148_v8, %v1651_v32 }
  0x89   :  { %v113_v43 = vsel %vm105_vm0, %v101_v27, %v109_v37  ;;  %v115_v44 = vsel %vm107_vm1, %v103_v26, %v111_v38  ;;  %v166_v52 = vmul.f32 %v150_v12, %v80_v34  ;;  %v168_v61 = vmul.f32 %v152_v15, %v1651_v32 }
  0x8a   :  { %v1660_v46 = vadd.f32 %v117_v36, %v113_v43  ;;  %v1309_v47 = vpack.c.bf16 %v162_v41, %v161_v30  ;;  %v1313_v48 = vpack.c.bf16 %v164_v42, %v163_v31  ;;  %vm106_vm2 = vcmp.gt.f32.partialorder %v102_v40, 0.0  ;;  %v391_v41 = vld [vmem:[%s1856_s8 + $0x8] sm:$0xff]  ;;  %v392_v43 = vld [vmem:[%s1856_s8 + $0x10] sm:$0xff] }
  0x8b   :  { %v110_v49 = vmul.f32 0.2, %v102_v40  ;;  %v1666_v51 = vadd.f32 %v119_v45, %v115_v44  ;;  %vm108_vm3 = vcmp.gt.f32.partialorder %v104_v39, 0.0  ;;  %v112_v53 = vmul.f32 0.2, %v104_v39  ;;  %v393_v44 = vld [vmem:[%s1856_s8 + $0x18] sm:$0xff] }
  0x8c   :  { %125 = vmax.xlane.f32.xlu0 %v1660_v46  ;;  %1310 = vmatprep.subr.bf16.mxu0 %v1309_v47  ;;  %v1317_v59 = vpack.c.bf16 %v166_v52, %v165_v56  ;;  %v1321_v1 = vpack.c.bf16 %v168_v61, %v167_v60  ;;  %v170_v2 = vmul.f32 %v154_v62, %v80_v34  ;;  %v398_v52 = vld [vmem:[%s1856_s8 + $0x40] sm:$0xff]  ;;  %v401_v56 = vld [vmem:[%s1856_s8 + $0x58] sm:$0xff]  ;;  %v404_v61 = vld [vmem:[%s1856_s8 + $0x70] sm:$0xff] }
  0x8d   :  { %1312 = vmatpush3.bf16.msra.mxu0 %v1309_v47  ;;  %v114_v54 = vsel %vm106_vm2, %v102_v40, %v110_v49  ;;  %v116_v57 = vsel %vm108_vm3, %v104_v39, %v112_v53  ;;  %v172_v8 = vmul.f32 %v156_v4, %v1651_v32  ;;  %v174_v12 = vmul.f32 %v158_v9, %v80_v34  ;;  %v390_v40 = vld [vmem:[%s1856_s8] sm:$0xff]  ;;  %v395_v47 = vld [vmem:[%s1856_s8 + $0x28] sm:$0xff]  ;;  %v396_v49 = vld [vmem:[%s1856_s8 + $0x30] sm:$0xff] }
  0x8e   :  { %1314 = vmatprep.subr.bf16.mxu0 %v1313_v48  ;;  %v1668_v55 = vadd.f32 %v118_v50, %v114_v54  ;;  %v124_v63 = vadd.f32 %v120_v58, %v116_v57  ;;  %v1325_v6 = vpack.c.bf16 %v170_v2, %v169_v5  ;;  %v173_v15 = vmul.f32 %v157_v10, %v1647_v24  ;;  %v397_v50 = vld [vmem:[%s1856_s8 + $0x38] sm:$0xff]  ;;  %v399_v53 = vld [vmem:[%s1856_s8 + $0x48] sm:$0xff]  ;;  %v402_v58 = vld [vmem:[%s1856_s8 + $0x60] sm:$0xff] }
  0x8f   :  { %v1329_v11 = vpack.c.bf16 %v172_v8, %v171_v7  ;;  %v175_v18 = vmul.f32 %v159_v13, %v1645_v22  ;;  %v176_v19 = vmul.f32 %v160_v14, %v1651_v32  ;;  %v1365_v23 = vpack.c.bf16 %v158_v9, %v157_v10  ;;  %v405_v62 = vld [vmem:[%s1856_s8 + $0x78] sm:$0xff]  ;;  %v493_v2 = vld [vmem:[%s1857_s9 + $0x10] sm:$0xff] }
  0x90   :  { %129 = vmax.xlane.f32.xlu0 %v1666_v51  ;;  %127 = vmax.xlane.f32.xlu1 %v1668_v55  ;;  %v1333_v17 = vpack.c.bf16 %v174_v12, %v173_v15  ;;  %v1369_v24 = vpack.c.bf16 %v160_v14, %v159_v13  ;;  %v1373_v42 = vpack.c.bf16 %v391_v41, %v390_v40  ;;  %v494_v4 = vld [vmem:[%s1857_s9 + $0x18] sm:$0xff]  ;;  %vm1007_vm2 = vcmask 9216  }
  0x91   :  { %1316 = vmatpush3.bf16.msra.mxu0 %v1313_v48  ;;  %v1337_v21 = vpack.c.bf16 %v176_v19, %v175_v18  ;;  %1366 = vmatprep.subr.bf16.mxu1 %v1365_v23  ;;  %v1377_v45 = vpack.c.bf16 %v393_v44, %v392_v43  ;;  %v1389_v54 = vpack.c.bf16 %v399_v53, %v398_v52  ;;  %v1038_v19 = vld [vmem:[%s1854_s6] ss:$0 sm:$0xff] }
  0x92   :  { %1318 = vmatprep.subr.bf16.mxu0 %v1317_v59  ;;  %1368 = vmatpush3.bf16.msra.mxu1 %v1365_v23  ;;  %v1409_v5 = vpack.c.bf16 %v494_v4, %v493_v2 }
  0x93   :  { %1370 = vmatprep.subr.bf16.mxu1 %v1369_v24 }
  0x94   :  { %131 = vmax.xlane.f32.xlu0 %v124_v63 }
  0x95   :  { %1320 = vmatpush3.bf16.msra.mxu0 %v1317_v59  ;;  %v403_v59 = vld [vmem:[%s1856_s8 + $0x68] sm:$0xff] }
  0x96   :  { %1322 = vmatprep.subr.bf16.mxu0 %v1321_v1  ;;  %1372 = vmatpush3.bf16.msra.mxu1 %v1369_v24  ;;  %v1397_v60 = vpack.c.bf16 %v403_v59, %v402_v58  ;;  %v645_v59 = vlaneseq }
  0x99   :  { %1324 = vmatpush3.bf16.msra.mxu0 %v1321_v1  ;;  %v492_v1 = vld [vmem:[%s1857_s9 + $0x8] sm:$0xff] }
  0x9a   :  { %1326 = vmatprep.subr.bf16.mxu0 %v1325_v6  ;;  %v1405_v3 = vpack.c.bf16 %v492_v1, %v491_v0 }
  0x9c   :  { %1406 = vmatprep.subr.bf16.mxu1 %v1405_v3 }
  0x9d   :  { %1328 = vmatpush3.bf16.msra.mxu0 %v1325_v6 }
  0x9e   :  { %1330 = vmatprep.subr.bf16.mxu0 %v1329_v11 }
  0xa1   :  { %1332 = vmatpush3.bf16.msra.mxu0 %v1329_v11 }
  0xa2   :  { %1334 = vmatprep.subr.bf16.mxu0 %v1333_v17 }
  0xa5   :  { %1336 = vmatpush3.bf16.msra.mxu0 %v1333_v17 }
  0xa6   :  { %1338 = vmatprep.subr.bf16.mxu0 %v1337_v21 }
  0xa9   :  { %1340 = vmatpush3.bf16.msra.mxu0 %v1337_v21 }
  0xaa   :  { %1374 = vmatprep.subr.bf16.mxu0 %v1373_v42 }
 0x119   :  { %v126_v22 = vpop.xlane.xlu0 %125 }
 0x11a   :  { %v133_v25 = vsub.f32 %v1660_v46, %v126_v22  ;;  %v394_v46 = vld [vmem:[%s1856_s8 + $0x20] sm:$0xff] }
 0x11b   :  { %v1381_v48 = vpack.c.bf16 %v395_v47, %v394_v46  ;;  %v1520_v47 = vmov 1  }
 0x11c   :  { %v137_v26 = vmul.f32 1.442695, %v133_v25  ;;  %1441 = vset.pattern.permute.xlu0 %v1520_v47  ;;  %1442 = vset.pattern.permute.xlu1 %v1520_v47  ;;  %v1521_v47 = vmov 0.0|0.0  }
 0x11d   :  { %v128_v27 = vpop.xlane.xlu1 %127  ;;  %v130_v28 = vpop.xlane.xlu0 %129 }
 0x11e   :  { %1443 = vpow2.f32 %v137_v26  ;;  %v134_v29 = vsub.f32 %v1668_v55, %v128_v27  ;;  %v135_v30 = vsub.f32 %v1666_v51, %v130_v28  ;;  %v1385_v51 = vpack.c.bf16 %v397_v50, %v396_v49  ;;  %v400_v55 = vld [vmem:[%s1856_s8 + $0x50] sm:$0xff] }
 0x11f   :  { %v1393_v57 = vpack.c.bf16 %v401_v56, %v400_v55 }
 0x120   :  { %v139_v31 = vmul.f32 1.442695, %v134_v29  ;;  %v141_v32 = vmul.f32 1.442695, %v135_v30 }
 0x121   :  { %v132_v33 = vpop.xlane.xlu0 %131 }
 0x122   :  { %1445 = vpow2.f32 %v139_v31  ;;  %v136_v34 = vsub.f32 %v124_v63, %v132_v33  ;;  %v1401_v63 = vpack.c.bf16 %v405_v62, %v404_v61  ;;  %v646_v61 = vshrl.u32 %v645_v59, 7  ;;  %v1051_v59 = vld [vmem:[%s1858_s10] ss:$0 sm:$0xff] }
 0x123   :  { %1447 = vpow2.f32 %v141_v32 }
 0x124   :  { %v143_v35 = vmul.f32 1.442695, %v136_v34 }
 0x126   :  { %1449 = vpow2.f32 %v143_v35 }
 0x128   :  { %v1444_v36 = vpop.eup %1443 }
 0x129   :  { %1177 = vmatprep.mubr.f32.mxu0 %v1444_v36  ;;  %1215 = vmatprep.mubr.f32.mxu1 %v1444_v36 }
 0x12c   :  { %v1446_v37 = vpop.eup %1445 }
 0x12d   :  { %v1448_v38 = vpop.eup %1447  ;;  %1178 = vmatmul.mubr.f32.vlgmr.msra.gmra.mrb[0].mxu0 %v1446_v37  ;;  %1216 = vmatmul.mubr.f32.vlgmr.msra.gmra.mrb[0].mxu1 %v1446_v37 }
 0x12e   :  { %1180 = vmatprep.mubr.f32.mxu0 %v1448_v38  ;;  %1218 = vmatprep.mubr.f32.mxu1 %v1448_v38 }
 0x12f   :  { %1376 = vmatpush3.bf16.msra.mxu0 %v1373_v42  ;;  %1408 = vmatpush3.bf16.msra.mxu1 %v1405_v3 }
 0x130   :  { %v1450_v39 = vpop.eup %1449  ;;  %1378 = vmatprep.subr.bf16.mxu0 %v1377_v45  ;;  %1410 = vmatprep.subr.bf16.mxu1 %v1409_v5 }
 0x131   :  { %1181 = vmatmul.mubr.f32.gmra.mrb[2].mxu0 %v1450_v39  ;;  %1219 = vmatmul.mubr.f32.gmra.mrb[2].mxu1 %v1450_v39 }
 0x133   :  { %1380 = vmatpush3.bf16.msra.mxu0 %v1377_v45  ;;  %1412 = vmatpush3.bf16.msra.mxu1 %v1409_v5 }
 0x134   :  { %1382 = vmatprep.subr.bf16.mxu0 %v1381_v48 }
 0x137   :  { %1384 = vmatpush3.bf16.msra.mxu0 %v1381_v48 }
 0x138   :  { %1386 = vmatprep.subr.bf16.mxu0 %v1385_v51 }
 0x13b   :  { %1388 = vmatpush3.bf16.msra.mxu0 %v1385_v51 }
 0x13c   :  { %1390 = vmatprep.subr.bf16.mxu0 %v1389_v54 }
 0x13f   :  { %1392 = vmatpush3.bf16.msra.mxu0 %v1389_v54 }
 0x140   :  { %1394 = vmatprep.subr.bf16.mxu0 %v1393_v57 }
 0x143   :  { %1396 = vmatpush3.bf16.msra.mxu0 %v1393_v57 }
 0x144   :  { %1398 = vmatprep.subr.bf16.mxu0 %v1397_v60 }
 0x147   :  { %1400 = vmatpush3.bf16.msra.mxu0 %v1397_v60 }
 0x148   :  { %1402 = vmatprep.subr.bf16.mxu0 %v1401_v63 }
 0x14b   :  { %1404 = vmatpush3.bf16.msra.mxu0 %v1401_v63  ;;  %v647_v63 = vsub.s32 0, %v646_v61 }
 0x200   :  { %v1179_v6 = vpop.f32.mrb[0].mxu0  ;;  %v1217_v7 = vpop.f32.mrb[0].mxu1 }
 0x201   :  { %v348_v8 = vmax.f32 %v1217_v7, 1e-20  ;;  %v243_v9 = vpop.f32.mrb[1].mxu0  ;;  %v328_v10 = vpop.f32.mrb[1].mxu1  ;;  %v667_v7 = vld [vmem:[%s1852_s4 + $0x10] sm:$0xff] }
 0x202   :  { %v347_v11 = vmax.f32 %v328_v10, 1e-20 }
 0x203   :  { %1451 = vrcp.f32 %v348_v8  ;;  %v665_v8 = vld [vmem:[%s1852_s4] sm:$0xff] }
 0x204   :  { %1453 = vrcp.f32 %v347_v11  ;;  %v1182_v12 = vpop.f32.mrb[2].mxu0  ;;  %v1220_v13 = vpop.f32.mrb[2].mxu1 }
 0x205   :  { %v350_v14 = vmax.f32 %v1220_v13, 1e-20  ;;  %v253_v15 = vpop.f32.mrb[3].mxu0  ;;  %v338_v16 = vpop.f32.mrb[3].mxu1 }
 0x206   :  { %v349_v17 = vmax.f32 %v338_v16, 1e-20 }
 0x207   :  { %1455 = vrcp.f32 %v350_v14  ;;  %v666_v14 = vld [vmem:[%s1852_s4 + $0x8] sm:$0xff] }
 0x208   :  { %1457 = vrcp.f32 %v349_v17 }
 0x20d   :  { %v1452_v18 = vpop.eup %1451 }
 0x20e   :  { %v1454_v20 = vpop.eup %1453  ;;  %v356_v21 = vmul.f32 %v1452_v18, %v1179_v6 }
 0x20f   :  { %v355_v23 = vmul.f32 %v1454_v20, %v243_v9 }
 0x210   :  { %v367_v24 = vadd.f32 %v1038_v19, %v356_v21 }
 0x211   :  { %v1456_v22 = vpop.eup %1455  ;;  %v366_v25 = vadd.f32 %v1038_v19, %v355_v23 }
 0x212   :  { %v1458_v26 = vpop.eup %1457  ;;  %v376_v27 = vmul.f32 1.442695, %v367_v24  ;;  %v358_v28 = vmul.f32 %v1456_v22, %v1182_v12  ;;  %vm371_vm5 = vcmp.gt.f32.partialorder %v367_v24, 0.0 }
 0x213   :  { %v374_v29 = vmul.f32 1.442695, %v366_v25  ;;  %v357_v30 = vmul.f32 %v1458_v26, %v253_v15  ;;  %vm370_vm4 = vcmp.gt.f32.partialorder %v366_v25, 0.0 }
 0x214   :  { %1459 = vpow2.f32 %v376_v27  ;;  %v369_v31 = vadd.f32 %v1038_v19, %v358_v28 }
 0x215   :  { %1461 = vpow2.f32 %v374_v29  ;;  %v368_v32 = vadd.f32 %v1038_v19, %v357_v30 }
 0x216   :  { %v380_v33 = vmul.f32 1.442695, %v369_v31  ;;  %vm373_vm7 = vcmp.gt.f32.partialorder %v369_v31, 0.0 }
 0x217   :  { %v378_v34 = vmul.f32 1.442695, %v368_v32  ;;  %vm372_vm6 = vcmp.gt.f32.partialorder %v368_v32, 0.0 }
 0x218   :  { %1463 = vpow2.f32 %v380_v33 }
 0x219   :  { %1465 = vpow2.f32 %v378_v34 }
 0x21e   :  { %v1460_v35 = vpop.eup %1459 }
 0x21f   :  { %v1462_v36 = vpop.eup %1461  ;;  %v1040_v37 = vadd.f32 -1.0, %v1460_v35 }
 0x220   :  { %v1039_v38 = vadd.f32 -1.0, %v1462_v36 }
 0x221   :  { %v387_v42 = vsel %vm371_vm5, %v367_v24, %v1040_v37  ;;  %v668_v24 = vld [vmem:[%s1852_s4 + $0x18] sm:$0xff] }
 0x222   :  { %v1464_v39 = vpop.eup %1463  ;;  %v386_v40 = vsel %vm370_vm4, %v366_v25, %v1039_v38 }
 0x223   :  { %v1466_v41 = vpop.eup %1465  ;;  %1253 = vmatprep.mubr.f32.mxu0 %v386_v40  ;;  %v1042_v43 = vadd.f32 -1.0, %v1464_v39 }
 0x224   :  { %1254 = vmatmul.mubr.f32.vlgmr.msra.gmra.mrb[4].mxu0 %v387_v42  ;;  %v1041_v44 = vadd.f32 -1.0, %v1466_v41 }
 0x225   :  { %v389_v46 = vsel %vm373_vm7, %v369_v31, %v1042_v43 }
 0x226   :  { %v388_v45 = vsel %vm372_vm6, %v368_v32, %v1041_v44 }
 0x227   :  { %1256 = vmatprep.mubr.f32.mxu0 %v388_v45 }
 0x228   :  { %1257 = vmatmul.mubr.f32.gmra.mrb[6].mxu0 %v389_v46 }
 0x2f7   :  { %v1255_v48 = vpop.f32.mrb[4].mxu0 }
 0x2f8   :  { %v472_v49 = vpop.f32.mrb[5].mxu0 }
 0x2f9   :  { %v1413_v50 = vpack.c.bf16 %v1255_v48, %v472_v49  ;;  %1267 = vmatprep.mubr.msk.f32.mxu1 %vm495_vm8, %v472_v49 }
 0x2fa   :  { %1268 = vmatmul.mubr.msk.f32.vlgmr.msra.gmra.mrb[4].mxu1 %vm495_vm8, %v1255_v48  ;;  %v1523_v48 = vmov 0.0  }
 0x2fb   :  { %v1258_v51 = vpop.f32.mrb[6].mxu0  ;;  %1414 = vmatprep.subr.bf16.mxu1 %v1413_v50 }
 0x2fc   :  { %v482_v52 = vpop.f32.mrb[7].mxu0  ;;  %1416 = vmatpush3.bf16.msra.mxu1 %v1413_v50 }
 0x2fd   :  { %v1417_v53 = vpack.c.bf16 %v1258_v51, %v482_v52  ;;  %1270 = vmatprep.mubr.msk.f32.mxu1 %vm495_vm8, %v482_v52 }
 0x2fe   :  { %1271 = vmatmul.mubr.msk.f32.gmra.mrb[6].mxu1 %vm495_vm8, %v1258_v51 }
 0x2ff   :  { %1418 = vmatprep.subr.bf16.mxu1 %v1417_v53 }
 0x300   :  { %1420 = vmatpush3.bf16.msra.mxu1 %v1417_v53 }
 0x301   :  { %1421 = vmatprep.subr.bf16.mxu1 %v1521_v47 }
 0x3cd   :  { %v1269_v54 = vpop.f32.mrb[4].mxu1 }
 0x3ce   :  { %632 = vperm.xlu0 %1441, %v1269_v54   ;;  %v574_v55 = vpop.f32.mrb[5].mxu1 }
 0x3cf   :  { %627 = vperm.xlu1 %1442, %v574_v55  }
 0x3d1   :  { %v1272_v56 = vpop.f32.mrb[6].mxu1 }
 0x3d2   :  { %v584_v57 = vpop.f32.mrb[7].mxu1 }
 0x3d3   :  { %642 = vperm.xlu1 %1442, %v1272_v56  }
 0x3d7   :  { %637 = vperm.xlu1 %1442, %v584_v57  }
 0x400   :  { %593 = vxpose.xlu1.b32.start [1/4] (short) (narrow) %v574_v55, 8 }
 0x404   :  { %594 = vxpose.xlu1.b32.cont [2/4] (short) (narrow) %v1269_v54, 8 }
 0x408   :  { %595 = vxpose.xlu1.b32.cont [3/4] (short) (narrow) %v584_v57, 8 }
 0x40c   :  { %596 = vxpose.xlu1.b32.end [4/4] (short) (narrow) %v1272_v56, 8 }
 0x44d   :  { %v633_v2 = vpop.permute.xlu0 %632 }
 0x44e   :  { %v628_v58 = vpop.permute.xlu1 %627 }
 0x452   :  { %v643_v60 = vpop.permute.xlu1 %642 }
 0x456   :  { %v638_v62 = vpop.permute.xlu1 %637 }
 0x480   :  { %v609_v0 = vpop.trf.xlu1 }
 0x481   :  { %v648_v1 = vrot.slane %v609_v0, %v647_v63 }
 0x483   :  { %v651_v3 = vadd.f32 %v648_v1, %v638_v62  ;;  %v649_v4 = vadd.f32 %v648_v1, %v628_v58  ;;  %v650_v5 = vadd.f32 %v648_v1, %v633_v2  ;;  %v652_v6 = vadd.f32 %v648_v1, %v643_v60 }
 0x485   :  { %vm655_vm9 = vcmp.gt.f32.partialorder %v651_v3, 0.0  ;;  %v659_v9 = vmul.f32 0.2, %v651_v3  ;;  %vm653_vm10 = vcmp.gt.f32.partialorder %v649_v4, 0.0  ;;  %v657_v10 = vmul.f32 0.2, %v649_v4 }
 0x486   :  { %vm654_vm11 = vcmp.gt.f32.partialorder %v650_v5, 0.0  ;;  %v658_v11 = vmul.f32 0.2, %v650_v5  ;;  %v660_v15 = vmul.f32 0.2, %v652_v6  ;;  %vm656_vm12 = vcmp.gt.f32.partialorder %v652_v6, 0.0 }
 0x487   :  { %v663_v12 = vsel %vm655_vm9, %v651_v3, %v659_v9  ;;  %v661_v13 = vsel %vm653_vm10, %v649_v4, %v657_v10 }
 0x488   :  { %v671_v16 = vadd.f32 %v667_v7, %v663_v12  ;;  %v669_v17 = vadd.f32 %v665_v8, %v661_v13  ;;  %v662_v18 = vsel %vm654_vm11, %v650_v5, %v658_v11  ;;  %v664_v23 = vsel %vm656_vm12, %v652_v6, %v660_v15 }
 0x489   :  { %v670_v21 = vadd.f32 %v666_v14, %v662_v18  ;;  %v672_v25 = vadd.f32 %v668_v24, %v664_v23 }
 0x48a   :  { %v679_v19 = vsel %vm495_vm8, %v671_v16, -inf  ;;  %v673_v20 = vsel %vm495_vm8, %v669_v17, -inf }
 0x48b   :  { %680 = vmax.xlane.f32.xlu1 %v679_v19  ;;  %674 = vmax.xlane.f32.xlu0 %v673_v20  ;;  %v676_v22 = vsel %vm495_vm8, %v670_v21, -inf  ;;  %v682_v26 = vsel %vm495_vm8, %v672_v25, -inf }
 0x48f   :  { %677 = vmax.xlane.f32.xlu0 %v676_v22 }
 0x493   :  { %683 = vmax.xlane.f32.xlu0 %v682_v26 }
 0x518   :  { %v681_v27 = vpop.xlane.xlu1 %680  ;;  %v675_v28 = vpop.xlane.xlu0 %674 }
 0x519   :  { %v685_v29 = vsub.f32 %v669_v17, %v675_v28  ;;  %v687_v30 = vsub.f32 %v671_v16, %v681_v27  ;;  %v923_v27 = vld [vmem:[%s1860_s12] sm:$0xff]  ;;  %v924_v28 = vld [vmem:[%s1860_s12 + $0x8] sm:$0xff] }
 0x51b   :  { %v689_v31 = vmul.f32 1.442695, %v685_v29  ;;  %v693_v34 = vmul.f32 1.442695, %v687_v30  ;;  %v849_v30 = vld [vmem:[%s1859_s11] sm:$0x3] }
 0x51c   :  { %v678_v32 = vpop.xlane.xlu0 %677 }
 0x51d   :  { %v686_v33 = vsub.f32 %v670_v21, %v678_v32  ;;  %1467 = vpow2.f32 %v689_v31  ;;  %v1428_v31 = vpack.c.bf16 %v924_v28, %v923_v27  ;;  %v925_v32 = vld [vmem:[%s1860_s12 + $0x10] sm:$0xff] }
 0x51f   :  { %v691_v35 = vmul.f32 1.442695, %v686_v33  ;;  %v926_v33 = vld [vmem:[%s1860_s12 + $0x18] sm:$0xff]  ;;  %s1524_s12 = smov [#allocation2]  }
 0x520   :  { %v684_v36 = vpop.xlane.xlu0 %683 }
 0x521   :  { %1469 = vpow2.f32 %v691_v35  ;;  %v688_v37 = vsub.f32 %v672_v25, %v684_v36 }
 0x522   :  { %1471 = vpow2.f32 %v693_v34  ;;  %v1431_v34 = vpack.c.bf16 %v926_v33, %v925_v32 }
 0x523   :  { %v695_v38 = vmul.f32 1.442695, %v688_v37  ;;  %v1057_v37 = vld [vmem:[%s1861_s13] ss:$0 sm:$0xff]  ;;  %s1027_s13 = sshll.u32 %s1524_s12, 4  ;;  %s1028_s13 = int_to_ptr.vmem [resolvable:$true] %s1027_s13 }
 0x524   :  { %s1495_s21 = scalar_lea.vmem %s1028_s13, 32  ;;  %p1500_p1 = scmp.lt.s32.totalorder %s1028_s13, %s1028_s13 }
 0x525   :  { %1473 = vpow2.f32 %v695_v38  ;;  %p1496_p0 = scmp.ne.s32.totalorder %s1028_s13, %s1495_s21  ;;  %p1501_p2 = scmp.lt.s32.totalorder %s1495_s21, %s1495_s21 }
 0x527   :  { %v1468_v39 = vpop.eup %1467  ;;  %p1502_p3 = por %p1501_p2, %p1500_p1 }
 0x528   :  { %1281 = vmatprep.mubr.msk.f32.mxu1 %vm495_vm8, %v1468_v39  ;;  %v697_v44 = vsel %vm495_vm8, %v1468_v39, 0.0 }
 0x529   :  { %p1503_p4 = pnand %p1502_p3, %p1496_p0 }
 0x52b   :  { %v1470_v40 = vpop.eup %1469 }
 0x52c   :  { %v1472_v41 = vpop.eup %1471  ;;  %1282 = vmatmul.mubr.msk.f32.vlgmr.msra.gmra.mrb[8].mxu1 %vm495_vm8, %v1470_v40  ;;  %v700_v42 = vsel %vm495_vm8, %v1470_v40, 0.0 }
 0x52d   :  { %1284 = vmatprep.mubr.msk.f32.mxu1 %vm495_vm8, %v1472_v41  ;;  %701 = vadd.xlane.f32.xlu0 %v700_v42  ;;  %v703_v45 = vsel %vm495_vm8, %v1472_v41, 0.0 }
 0x52f   :  { %v1474_v43 = vpop.eup %1473 }
 0x530   :  { %1285 = vmatmul.mubr.msk.f32.gmra.mrb[10].mxu1 %vm495_vm8, %v1474_v43  ;;  %v706_v46 = vsel %vm495_vm8, %v1474_v43, 0.0 }
 0x531   :  { %698 = vadd.xlane.f32.xlu0 %v697_v44  ;;  %1295 = vmatprep.mubr.msk.f32.mxu1 %vm1522_vm13, %v1523_v48 }
 0x535   :  { %704 = vadd.xlane.f32.xlu0 %v703_v45 }
 0x539   :  { %707 = vadd.xlane.f32.xlu0 %v706_v46 }
 0x5ba   :  { %v702_v49 = vpop.xlane.xlu0 %701 }
 0x5bb   :  { %v710_v52 = vmax.f32 %v702_v49, 1e-20 }
 0x5bd   :  { %1475 = vrcp.f32 %v710_v52 }
 0x5be   :  { %v699_v50 = vpop.xlane.xlu0 %698 }
 0x5bf   :  { %v709_v53 = vmax.f32 %v699_v50, 1e-20 }
 0x5c1   :  { %1477 = vrcp.f32 %v709_v53 }
 0x5c2   :  { %v705_v51 = vpop.xlane.xlu0 %704 }
 0x5c3   :  { %v711_v56 = vmax.f32 %v705_v51, 1e-20 }
 0x5c6   :  { %v708_v54 = vpop.xlane.xlu0 %707 }
 0x5c7   :  { %v712_v55 = vmax.f32 %v708_v54, 1e-20  ;;  %v1476_v57 = vpop.eup %1475 }
 0x5c9   :  { %1479 = vrcp.f32 %v712_v55 }
 0x5ca   :  { %1481 = vrcp.f32 %v711_v56 }
 0x5cb   :  { %v1478_v60 = vpop.eup %1477 }
 0x5d3   :  { %v1480_v1 = vpop.eup %1479 }
 0x5d4   :  { %v1482_v4 = vpop.eup %1481 }
 0x5ff   :  { %v1283_v58 = vpop.f32.mrb[8].mxu1 }
 0x600   :  { %v815_v61 = vmul.f32 %v1476_v57, %v1283_v58  ;;  %v791_v62 = vpop.f32.mrb[9].mxu1 }
 0x601   :  { %v814_v63 = vmul.f32 %v1478_v60, %v791_v62 }
 0x602   :  { %v826_v0 = vadd.f32 %v1051_v59, %v815_v61 }
 0x603   :  { %v825_v2 = vadd.f32 %v1051_v59, %v814_v63  ;;  %v1286_v3 = vpop.f32.mrb[10].mxu1 }
 0x604   :  { %v835_v5 = vmul.f32 1.442695, %v826_v0  ;;  %v817_v6 = vmul.f32 %v1480_v1, %v1286_v3  ;;  %v801_v7 = vpop.f32.mrb[11].mxu1  ;;  %vm830_vm14 = vcmp.gt.f32.partialorder %v826_v0, 0.0 }
 0x605   :  { %v833_v8 = vmul.f32 1.442695, %v825_v2  ;;  %v816_v9 = vmul.f32 %v1482_v4, %v801_v7  ;;  %vm829_vm15 = vcmp.gt.f32.partialorder %v825_v2, 0.0 }
 0x606   :  { %1483 = vpow2.f32 %v835_v5  ;;  %v828_v10 = vadd.f32 %v1051_v59, %v817_v6 }
 0x607   :  { %1485 = vpow2.f32 %v833_v8  ;;  %v827_v11 = vadd.f32 %v1051_v59, %v816_v9 }
 0x608   :  { %v839_v12 = vmul.f32 1.442695, %v828_v10  ;;  %vm832_vm0 = vcmp.gt.f32.partialorder %v828_v10, 0.0 }
 0x609   :  { %v837_v13 = vmul.f32 1.442695, %v827_v11  ;;  %vm831_vm1 = vcmp.gt.f32.partialorder %v827_v11, 0.0 }
 0x60a   :  { %1487 = vpow2.f32 %v839_v12 }
 0x60b   :  { %1489 = vpow2.f32 %v837_v13 }
 0x610   :  { %v1484_v14 = vpop.eup %1483 }
 0x611   :  { %v1486_v15 = vpop.eup %1485  ;;  %v1053_v16 = vadd.f32 -1.0, %v1484_v14 }
 0x612   :  { %v1052_v17 = vadd.f32 -1.0, %v1486_v15 }
 0x613   :  { %v846_v18 = vsel %vm830_vm14, %v826_v0, %v1053_v16 }
 0x614   :  { %v1488_v19 = vpop.eup %1487  ;;  %v845_v20 = vsel %vm829_vm15, %v825_v2, %v1052_v17 }
 0x615   :  { %v1490_v21 = vpop.eup %1489  ;;  %v1055_v23 = vadd.f32 -1.0, %v1488_v19  ;;  %v1422_v24 = vpack.c.bf16 %v846_v18, %v845_v20 }
 0x616   :  { %v1054_v22 = vadd.f32 -1.0, %v1490_v21 }
 0x617   :  { %v848_v25 = vsel %vm832_vm0, %v828_v10, %v1055_v23  ;;  %1423 = vmatpush3.bf16.msra.mxu1 %v1422_v24 }
 0x618   :  { %v847_v26 = vsel %vm831_vm1, %v827_v11, %v1054_v22  ;;  %1424 = vmatprep.subr.bf16.mxu1 %v1521_v47 }
 0x619   :  { %v1425_v29 = vpack.c.bf16 %v848_v25, %v847_v26 }
 0x61b   :  { %1426 = vmatpush3.bf16.msra.mxu1 %v1425_v29 }
 0x61c   :  { %1427 = vmatprep.subr.bf16.mxu1 %v1521_v47 }
 0x61e   :  { %1296 = vmatmul.mubr.msk.f32.vlgmr.msra.gmra.mrb[12].mxu1 %vm495_vm8, %v849_v30 }
 0x61f   :  { %1429 = vmatpush3.bf16.msra.mxu1 %v1428_v31  ;;  %1306 = vmatprep.mubr.msk.f32.mxu1 %vm1522_vm13, %v1523_v48 }
 0x620   :  { %1430 = vmatprep.subr.bf16.mxu1 %v1521_v47 }
 0x623   :  { %1432 = vmatpush3.bf16.msra.mxu1 %v1431_v34 }
 0x6f1   :  { %v919_v35 = vpop.f32.mrb[12].mxu1 }
 0x6f2   :  { %v1297_v36 = vpop.f32.mrb[13].mxu1  ;;  %1307 = vmatmul.mubr.msk.f32.vlgmr.msra.gmra.mrb[14].mxu1 %vm495_vm8, %v919_v35 }
 0x7c5   :  { %v1003_v38 = vpop.f32.mrb[14].mxu1 }
 0x7c6   :  { %v1004_v39 = vadd.f32 %v1057_v37, %v1003_v38  ;;  %v1308_v40 = vpop.f32.mrb[15].mxu1 }
 0x7c8   :  { %v1008_v41 = vsel %vm1007_vm2, %v1004_v39, -inf }
 0x7c9   :  { %1009 = vmax.xlane.f32.xlu0 %v1008_v41 }
 0x856   :  { %v1010_v42 = vpop.xlane.xlu0 %1009 }
 0x857   :  { %v1011_v43 = vsub.f32 %v1004_v39, %v1010_v42 }
 0x859   :  { %v1012_v44 = vmul.f32 1.442695, %v1011_v43 }
 0x85b   :  { %1491 = vpow2.f32 %v1012_v44 }
 0x865   :  { %v1492_v45 = vpop.eup %1491 }
 0x866   :  { %v1014_v46 = vsel %vm1007_vm2, %v1492_v45, 0.0 }
 0x867   :  { %1015 = vadd.xlane.f32.xlu0 %v1014_v46 }
 0x8f4   :  { %v1016_v47 = vpop.xlane.xlu0 %1015 }
 0x8f5   :  { %1493 = vlog2.f32 %v1016_v47 }
 0x8ff   :  { %v1494_v48 = vpop.eup %1493 }
 0x900   :  { %v1018_v49 = vmul.f32 0.6931472, %v1494_v48 }
 0x902   :  { %v1019_v50 = vsub.f32 %v1011_v43, %v1018_v49 }
 0x904   :  { %1020 = vst.msk [vmem:[#allocation2] sm:$0x3] %vm1007_vm2, %v1019_v50 }
 0x905   :  { %1506 = shalt.err (!%p1503_p4)
}
 0x906   :  { %s1507_s23 = scalar_lea.hbm %s1862_s14, 32 }
 0x907   :  { %p1508_p5 = scmp.ne.s32.totalorder %s1862_s14, %s1507_s23  ;;  %p1511_p6 = scmp.lt.u32.totalorder %s1507_s23, %s1862_s14 }
 0x909   :  { %p1513_p7 = pnand %p1511_p6, %p1508_p5 }
 0x90b   :  { %1516 = shalt.err (!%p1513_p7)
}
 0x90c   :  { %1030 = dma.vmem_to_hbm [thread:$0]  %s1028_s13, 32, %s1862_s14, [#allocation3]  }
 0x90d   :  { %1517 = dma.done.wait [#allocation3], 32  }
 0x90e   :  { %1518 = vsyncadd [#allocation3], 4294967264 }
 0x90f   :  { %1034 = vsyncpa [#allocation3], 1 }

</bundles_post_ra>
